<compile_context>
chip_gen: v6e
topology: v6e:2x2x1
jax: 0.10.0
libtpu: 0.0.40
codegen_flags: <defaults>
</compile_context>

<pallas_src>
import functools
import numpy as np
import jax
import jax.numpy as jnp
from jax.experimental import pallas as pl
from jax.experimental.pallas import tpu as pltpu


def _round_up(x, m):
    return ((x + m - 1) // m) * m


# ----------------------------------------------------------------------------
# Hardware-derived knobs
# ----------------------------------------------------------------------------

def _vmem_limit_bytes():
    # Raise the scoped-VMEM limit (default is 16 MiB on v5e / 32 MiB on v6e+),
    # but stay well inside v7x's 64 MiB physical VMEM.
    try:
        cap = int(pltpu.get_tpu_info().vmem_capacity_bytes)
        return int(max(32 * 2**20, min(0.75 * cap, 100 * 2**20)))
    except Exception:
        return 48 * 2**20


_VMEM_LIMIT = _vmem_limit_bytes()


def _compiler_params():
    return pltpu.CompilerParams(dimension_semantics=("parallel",),
                                vmem_limit_bytes=_VMEM_LIMIT)


def _probe_buffered1():
    """Feature-probe pl.Buffered(1) (single-buffer constant blocks)."""
    try:
        def k(x_ref, o_ref):
            o_ref[...] = x_ref[...] + 1.0
        f = pl.pallas_call(
            k,
            out_shape=jax.ShapeDtypeStruct((8, 128), jnp.float32),
            grid_spec=pltpu.PrefetchScalarGridSpec(
                num_scalar_prefetch=0, grid=(1,),
                in_specs=[pl.BlockSpec((8, 128), lambda i: (0, 0),
                                       pipeline_mode=pl.Buffered(1))],
                out_specs=pl.BlockSpec((8, 128), lambda i: (0, 0))))
        out = jax.block_until_ready(f(jnp.zeros((8, 128), jnp.float32)))
        return bool(jnp.all(out == 1.0))
    except Exception:
        return False


_HAS_BUFFERED1 = _probe_buffered1()


def _const_spec(shape):
    """Spec for blocks with a constant index map (weights / biases)."""
    zero_map = lambda i: (0,) * len(shape)
    if _HAS_BUFFERED1:
        return pl.BlockSpec(shape, zero_map, pipeline_mode=pl.Buffered(1))
    return pl.BlockSpec(shape, zero_map)


# ----------------------------------------------------------------------------
# Pallas kernels
# ----------------------------------------------------------------------------

def _matmul_bias_act_kernel(a_ref, w_ref, b_ref, o_ref, *, relu):
    acc = jnp.dot(a_ref[...], w_ref[...], preferred_element_type=jnp.float32)
    out = acc + b_ref[...]
    if relu:
        out = jnp.maximum(out, 0.0)
    o_ref[...] = out.astype(o_ref.dtype)


def _matmul_bias_res_relu_kernel(a_ref, w_ref, b_ref, r_ref, o_ref):
    # Fused: out = relu(a @ w + bias + residual)
    acc = jnp.dot(a_ref[...], w_ref[...], preferred_element_type=jnp.float32)
    out = acc + b_ref[...] + r_ref[...].astype(jnp.float32)
    o_ref[...] = jnp.maximum(out, 0.0).astype(o_ref.dtype)


def _conv3x3_flat_kernel(xlo_ref, xmid_ref, xhi_ref, w_ref, b_ref, mask_ref,
                         *rest, Wp, tm, cin, relu, has_res):
    """Implicit-GEMM 3x3 stride-1 conv over the guarded flat layout.

    The three x blocks are consecutive tm-row windows of the flattened padded
    image (blocks i, i+1, i+2); output rows live in block i+1.  Each of the 9
    taps is a static shifted slice of the concatenated window.
    """
    if has_res:
        res_ref, o_ref = rest
    else:
        (o_ref,) = rest
        res_ref = None

    xcat = jnp.concatenate([xlo_ref[...], xmid_ref[...], xhi_ref[...]], axis=0)
    acc = None
    for di in range(3):
        for dj in range(3):
            t = di * 3 + dj
            off = tm + (di - 1) * Wp + (dj - 1)      # static python int
            a = xcat[off:off + tm, :]
            wt = w_ref[pl.ds(t * cin, cin), :]
            d = jnp.dot(a, wt, preferred_element_type=jnp.float32)
            acc = d if acc is None else acc + d
    out = acc + b_ref[...]
    if has_res:
        out = out + res_ref[...].astype(jnp.float32)
    if relu:
        out = jnp.maximum(out, 0.0)
    # Re-zero border / tail rows so they act as the zero padding of the next
    # 3x3 conv in the chain (also scrubs any garbage read from guard blocks).
    out = jnp.where(mask_ref[...] > 0.5, out, 0.0)
    o_ref[...] = out.astype(o_ref.dtype)


def _head_kernel(*refs, n_parts):
    # relu(sum_i a_i @ w1_i + b1) @ w2 + b2  -- no 720-channel concat in HBM.
    a_refs = refs[:n_parts]
    w_refs = refs[n_parts:2 * n_parts]
    b1_ref, w2_ref, b2_ref, o_ref = refs[2 * n_parts:]
    h = None
    for a, w in zip(a_refs, w_refs):
        d = jnp.dot(a[...], w[...], preferred_element_type=jnp.float32)
        h = d if h is None else h + d
    h = jnp.maximum(h + b1_ref[...], 0.0)
    out = jnp.dot(h.astype(w2_ref.dtype), w2_ref[...],
                  preferred_element_type=jnp.float32)
    o_ref[...] = (out + b2_ref[...]).astype(o_ref.dtype)


def _addn_relu_kernel(*refs):
    o_ref = refs[-1]
    acc = refs[0][...].astype(jnp.float32)
    for r in refs[1:-1]:
        acc = acc + r[...].astype(jnp.float32)
    o_ref[...] = jnp.maximum(acc, 0.0).astype(o_ref.dtype)


def _sigmoid_kernel(x_ref, o_ref):
    o_ref[...] = jax.nn.sigmoid(x_ref[...].astype(jnp.float32)).astype(o_ref.dtype)


# ----------------------------------------------------------------------------
# GEMM wrapper (single-pass full-K GEMM with fused bias/ReLU/residual epilogue)
# ----------------------------------------------------------------------------

def _pick_tm(M):
    if M >= 1024:
        return 512           # big tiles -> near-roofline; >=2 blocks for 2-TC chips
    return M                 # small M: one full block, no per-step overhead


def matmul_bias_act(a, w, bias, relu, residual=None, out_dtype=jnp.bfloat16):
    """out = act(a @ w + bias [+ residual]); a (M,K) bf16, w (K,N) bf16."""
    M, K = a.shape
    N = w.shape[1]
    tm = _pick_tm(M)
    bias2 = bias.reshape(1, N).astype(jnp.float32)

    in_arrays = [a, w, bias2]
    in_specs = [pl.BlockSpec((tm, K), lambda i: (i, 0)),
                _const_spec((K, N)),
                _const_spec((1, N))]
    if residual is not None:
        in_arrays.append(residual)
        in_specs.append(pl.BlockSpec((tm, N), lambda i: (i, 0)))
        kernel = _matmul_bias_res_relu_kernel
    else:
        kernel = functools.partial(_matmul_bias_act_kernel, relu=relu)

    return pl.pallas_call(
        kernel,
        out_shape=jax.ShapeDtypeStruct((M, N), out_dtype),
        grid_spec=pltpu.PrefetchScalarGridSpec(
            num_scalar_prefetch=0, grid=(pl.cdiv(M, tm),),
            in_specs=in_specs,
            out_specs=pl.BlockSpec((tm, N), lambda i: (i, 0))),
        compiler_params=_compiler_params(),
    )(*in_arrays)


# ----------------------------------------------------------------------------
# Implicit-GEMM stride-1 3x3 conv in a guarded flat layout
# ----------------------------------------------------------------------------
#
# Layout: pad the NHWC image spatially by 1 and flatten (N,Hp,Wp,C) -> (M0,C).
# Prepend/append tm guard rows (+ tail padding up to a multiple of tm), giving
# (Mtot, C) with the real rows in [tm, tm+M0).  A 3x3 s1 conv then maps row m
# to sum_t x[m + shift_t] @ W_t with shift_t = (di-1)*Wp + (dj-1).  Rows whose
# padded coordinate lies on the image border (or in the tail) are re-zeroed by
# the kernel so they serve as the zero padding for the next conv in the chain.

def _pick_flat_tm(M0):
    if M0 >= 1024:
        return 512
    return _round_up(M0, 16)


@functools.lru_cache(maxsize=None)
def _interior_mask_np(N, Hp, Wp, tm):
    M0 = N * Hp * Wp
    Mg = _round_up(M0, tm)
    m = np.zeros((2 * tm + Mg, 1), np.float32)
    interior = np.zeros((N, Hp, Wp), np.float32)
    interior[:, 1:-1, 1:-1] = 1.0
    m[tm:tm + M0, 0] = interior.reshape(-1)
    return m


def to_flat(x, tm):
    N, H, W_, C = x.shape
    Hp, Wp = H + 2, W_ + 2
    M0 = N * Hp * Wp
    Mg = _round_up(M0, tm)
    xp = jnp.pad(x, ((0, 0), (1, 1), (1, 1), (0, 0)))
    flat = xp.reshape(M0, C)
    flat = jnp.pad(flat, ((tm, tm + Mg - M0), (0, 0)))
    return flat, (N, Hp, Wp)


def from_flat(y, meta, tm):
    N, Hp, Wp = meta
    M0 = N * Hp * Wp
    y = y[tm:tm + M0].reshape(N, Hp, Wp, -1)
    return y[:, 1:-1, 1:-1, :]


def conv3x3_flat(xflat, w, bias, mask, relu, meta, tm, residual=None):
    N, Hp, Wp = meta
    Mtot, cin = xflat.shape
    cout = w.shape[1]
    assert tm >= Wp + 1, "row tile too small for the implicit-GEMM window"
    nd = (Mtot - 2 * tm) // tm               # number of data tiles
    b2 = bias.reshape(1, cout).astype(jnp.float32)

    in_arrays = [xflat, xflat, xflat, w, b2, mask]
    in_specs = [pl.BlockSpec((tm, cin), lambda i: (i, 0)),
                pl.BlockSpec((tm, cin), lambda i: (i + 1, 0)),
                pl.BlockSpec((tm, cin), lambda i: (i + 2, 0)),
                _const_spec((9 * cin, cout)),
                _const_spec((1, cout)),
                pl.BlockSpec((tm, 1), lambda i: (i + 1, 0))]
    if residual is not None:
        in_arrays.append(residual)
        in_specs.append(pl.BlockSpec((tm, cout), lambda i: (i + 1, 0)))

    kernel = functools.partial(_conv3x3_flat_kernel, Wp=Wp, tm=tm, cin=cin,
                               relu=relu, has_res=residual is not None)
    return pl.pallas_call(
        kernel,
        out_shape=jax.ShapeDtypeStruct((Mtot, cout), jnp.bfloat16),
        grid_spec=pltpu.PrefetchScalarGridSpec(
            num_scalar_prefetch=0, grid=(nd,),
            in_specs=in_specs,
            out_specs=pl.BlockSpec((tm, cout), lambda i: (i + 1, 0))),
        compiler_params=_compiler_params(),
    )(*in_arrays)


# ----------------------------------------------------------------------------
# Convolution wrappers
# ----------------------------------------------------------------------------

def conv1x1(x, q, relu, residual=None):
    N, H, W_, Cin = x.shape
    Cout = q['w'].shape[1]
    A = x.reshape(N * H * W_, Cin)
    res2 = residual.reshape(N * H * W_, Cout) if residual is not None else None
    out = matmul_bias_act(A, q['w'], q['b'], relu, res2)
    return out.reshape(N, H, W_, Cout)


def conv2d_im2col(x, q, kh, kw, stride, pad, relu, residual=None):
    """Explicit-im2col conv (used for stride-2 convs and fallbacks)."""
    N, H, W_, Cin = x.shape
    Cout = q['w'].shape[1]
    Ho = (H + 2 * pad - kh) // stride + 1
    Wo = (W_ + 2 * pad - kw) // stride + 1
    if kh == 1 and kw == 1 and pad == 0 and stride == 1:
        A = x.reshape(N * H * W_, Cin)
    else:
        xp = jnp.pad(x, ((0, 0), (pad, pad), (pad, pad), (0, 0))) if pad > 0 else x
        cols = []
        for i in range(kh):
            for j in range(kw):
                cols.append(xp[:, i:i + stride * (Ho - 1) + 1:stride,
                               j:j + stride * (Wo - 1) + 1:stride, :])
        A = jnp.concatenate(cols, axis=-1).reshape(N * Ho * Wo, kh * kw * Cin)
    res2 = residual.reshape(N * Ho * Wo, Cout) if residual is not None else None
    out = matmul_bias_act(A, q['w'], q['b'], relu, res2)
    return out.reshape(N, Ho, Wo, Cout)


def conv3x3_s1(x, q, relu):
    """Standalone stride-1 3x3 conv via the implicit-GEMM flat kernel."""
    N, H, W_, _ = x.shape
    Hp, Wp = H + 2, W_ + 2
    M0 = N * Hp * Wp
    tm = _pick_flat_tm(M0)
    if Wp + 1 > tm:
        return conv2d_im2col(x, q, 3, 3, 1, 1, relu)
    xflat, meta = to_flat(x, tm)
    mask = jnp.asarray(_interior_mask_np(N, Hp, Wp, tm))
    y = conv3x3_flat(xflat, q['w'], q['b'], mask, relu, meta, tm)
    return from_flat(y, meta, tm)


# ----------------------------------------------------------------------------
# Elementwise Pallas kernels (lane-dense tiles)
# ----------------------------------------------------------------------------

def _lane_dense_2d(x):
    shp = x.shape
    total = int(np.prod(shp))
    for width in (512, 256, 128):
        if total % width == 0:
            return x.reshape(total // width, width), shp
    return x.reshape(int(np.prod(shp[:-1])), shp[-1]), shp


def _ew_tile(M, C):
    limit = max(16, (((1 << 19) // max(4 * C, 1)) // 16) * 16)
    return M if M <= limit else limit


def sigmoid_pallas(x):
    x2, shp = _lane_dense_2d(x)
    M, C = x2.shape
    tm = _ew_tile(M, C)
    out = pl.pallas_call(
        _sigmoid_kernel,
        out_shape=jax.ShapeDtypeStruct((M, C), jnp.float32),
        grid_spec=pltpu.PrefetchScalarGridSpec(
            num_scalar_prefetch=0, grid=(pl.cdiv(M, tm),),
            in_specs=[pl.BlockSpec((tm, C), lambda i: (i, 0))],
            out_specs=pl.BlockSpec((tm, C), lambda i: (i, 0))),
        compiler_params=_compiler_params(),
    )(x2)
    return out.reshape(shp)


def addn_relu(parts):
    """relu(sum(parts)) fused in one kernel (HR-module fusion)."""
    shp = parts[0].shape
    flats = [_lane_dense_2d(p)[0] for p in parts]
    M, C = flats[0].shape
    tm = _ew_tile(M, C)
    out = pl.pallas_call(
        _addn_relu_kernel,
        out_shape=jax.ShapeDtypeStruct((M, C), jnp.bfloat16),
        grid_spec=pltpu.PrefetchScalarGridSpec(
            num_scalar_prefetch=0, grid=(pl.cdiv(M, tm),),
            in_specs=[pl.BlockSpec((tm, C), lambda i: (i, 0)) for _ in flats],
            out_specs=pl.BlockSpec((tm, C), lambda i: (i, 0))),
        compiler_params=_compiler_params(),
    )(*flats)
    return out.reshape(shp)


# ----------------------------------------------------------------------------
# Fused head: relu(sum_i a_i @ w1_i + b1) @ w2 + b2 (no 720-ch concat in HBM)
# ----------------------------------------------------------------------------

def head_fused(feats, qh):
    N, H, W_, _ = feats[0].shape
    M = N * H * W_
    Cs = [int(f.shape[-1]) for f in feats]
    Ctot = sum(Cs)
    nc = qh['w2'].shape[1]
    A = [f.reshape(M, c) for f, c in zip(feats, Cs)]
    w1_parts, off = [], 0
    for c in Cs:
        w1_parts.append(qh['w1'][off:off + c, :])
        off += c
    b1 = qh['b1'].reshape(1, Ctot).astype(jnp.float32)
    b2 = qh['b2'].reshape(1, nc).astype(jnp.float32)
    tm = _pick_tm(M)

    in_arrays = A + w1_parts + [b1, qh['w2'], b2]
    in_specs = ([pl.BlockSpec((tm, c), lambda i: (i, 0)) for c in Cs]
                + [_const_spec((c, Ctot)) for c in Cs]
                + [_const_spec((1, Ctot)), _const_spec((Ctot, nc)),
                   _const_spec((1, nc))])
    out = pl.pallas_call(
        functools.partial(_head_kernel, n_parts=len(feats)),
        out_shape=jax.ShapeDtypeStruct((M, nc), jnp.float32),
        grid_spec=pltpu.PrefetchScalarGridSpec(
            num_scalar_prefetch=0, grid=(pl.cdiv(M, tm),),
            in_specs=in_specs,
            out_specs=pl.BlockSpec((tm, nc), lambda i: (i, 0))),
        compiler_params=_compiler_params(),
    )(*in_arrays)
    return out.reshape(N, H, W_, nc)


# ----------------------------------------------------------------------------
# Bilinear interpolation (plain-JAX glue, matches F.interpolate align_corners=False)
# ----------------------------------------------------------------------------

def _interp_matrix(out_size, in_size):
    o = np.arange(out_size, dtype=np.float64)
    src = (o + 0.5) * (in_size / out_size) - 0.5
    src = np.clip(src, 0.0, in_size - 1)
    i0 = np.floor(src).astype(np.int64)
    i1 = np.minimum(i0 + 1, in_size - 1)
    w1 = src - i0
    w0 = 1.0 - w1
    M = np.zeros((out_size, in_size), dtype=np.float32)
    np.add.at(M, (np.arange(out_size), i0), w0)
    np.add.at(M, (np.arange(out_size), i1), w1)
    return jnp.asarray(M)


def bilinear_resize_nhwc(x, out_h, out_w):
    N, H, W_, C = x.shape
    if out_h == H and out_w == W_:
        return x.astype(jnp.bfloat16)
    Ah = _interp_matrix(out_h, H).astype(jnp.bfloat16)
    Aw = _interp_matrix(out_w, W_).astype(jnp.bfloat16)
    xb = x.astype(jnp.bfloat16)
    y = jnp.einsum('oh,nhwc->nowc', Ah, xb,
                   preferred_element_type=jnp.float32).astype(jnp.bfloat16)
    y = jnp.einsum('pw,nowc->nopc', Aw, y, preferred_element_type=jnp.float32)
    return y.astype(jnp.bfloat16)


def bilinear_resize_nchw_f32(x, out_h, out_w):
    N, C, H, W_ = x.shape
    if out_h == H and out_w == W_:
        return x.astype(jnp.float32)
    Ah = _interp_matrix(out_h, H)
    Aw = _interp_matrix(out_w, W_)
    x = x.astype(jnp.float32)
    y = jnp.einsum('oh,nchw->ncow', Ah, x, preferred_element_type=jnp.float32)
    y = jnp.einsum('pw,ncow->ncop', Aw, y, preferred_element_type=jnp.float32)
    return y


# ----------------------------------------------------------------------------
# Parameter construction (raw) + BN pre-folding (prepared)
# ----------------------------------------------------------------------------

class Init:
    def __init__(self, key):
        self.key = key

    def next(self):
        self.key, sub = jax.random.split(self.key)
        return sub


def conv_params(init, kh, kw, cin, cout, bias=False):
    fan_in = kh * kw * cin
    w = jax.random.normal(init.next(), (kh, kw, cin, cout), jnp.float32) * (0.5 / np.sqrt(fan_in))
    p = {'w': w}
    if bias:
        p['b'] = 0.05 * jax.random.normal(init.next(), (cout,), jnp.float32)
    return p


def bn_params(init, c):
    return {
        'gamma': 1.0 + 0.01 * jax.random.normal(init.next(), (c,), jnp.float32),
        'beta': 0.01 * jax.random.normal(init.next(), (c,), jnp.float32),
        'mean': 0.01 * jax.random.normal(init.next(), (c,), jnp.float32),
        'var': jnp.abs(1.0 + 0.01 * jax.random.normal(init.next(), (c,), jnp.float32)),
    }


def make_bottleneck(init, cin, planes, downsample=False):
    out_c = planes * 4
    p = {'conv1': conv_params(init, 1, 1, cin, planes), 'bn1': bn_params(init, planes),
         'conv2': conv_params(init, 3, 3, planes, planes), 'bn2': bn_params(init, planes),
         'conv3': conv_params(init, 1, 1, planes, out_c), 'bn3': bn_params(init, out_c)}
    if downsample:
        p['down_conv'] = conv_params(init, 1, 1, cin, out_c)
        p['down_bn'] = bn_params(init, out_c)
    return p


def make_basic_block(init, cin, planes, downsample=False):
    p = {'conv1': conv_params(init, 3, 3, cin, planes), 'bn1': bn_params(init, planes),
         'conv2': conv_params(init, 3, 3, planes, planes), 'bn2': bn_params(init, planes)}
    if downsample:
        p['down_conv'] = conv_params(init, 1, 1, cin, planes)
        p['down_bn'] = bn_params(init, planes)
    return p


def make_hr_module(init, num_branches, num_inchannels, num_channels, num_blocks):
    branches = []
    for i in range(num_branches):
        blocks = []
        cin, ch = num_inchannels[i], num_channels[i]
        blocks.append(make_basic_block(init, cin, ch, cin != ch))
        for _ in range(1, num_blocks[i]):
            blocks.append(make_basic_block(init, ch, ch, False))
        branches.append(blocks)
    C = num_channels
    fuse = []
    for i in range(num_branches):
        row = []
        for j in range(num_branches):
            if j > i:
                row.append({'conv': conv_params(init, 1, 1, C[j], C[i]),
                            'bn': bn_params(init, C[i])})
            elif j == i:
                row.append(None)
            else:
                chain = []
                for k in range(i - j):
                    if k == i - j - 1:          # last: conv+BN (no ReLU)
                        chain.append({'conv': conv_params(init, 3, 3, C[j], C[i]),
                                      'bn': bn_params(init, C[i])})
                    else:                       # intermediate: conv+BN+ReLU
                        chain.append({'conv': conv_params(init, 3, 3, C[j], C[j]),
                                      'bn': bn_params(init, C[j])})
                row.append({'chain': chain})
        fuse.append(row)
    return {'branches': branches, 'fuse': fuse}


def make_hrnet_params(key, num_classes):
    init = Init(key)
    P = {}
    P['conv1'] = conv_params(init, 3, 3, 3, 64)
    P['bn1'] = bn_params(init, 64)
    P['conv2'] = conv_params(init, 3, 3, 64, 64)
    P['bn2'] = bn_params(init, 64)
    layer1 = [make_bottleneck(init, 64, 64, True)]
    for _ in range(3):
        layer1.append(make_bottleneck(init, 256, 64, False))
    P['layer1'] = layer1
    P['t1_0'] = {'conv': conv_params(init, 3, 3, 256, 48), 'bn': bn_params(init, 48)}
    P['t1_1'] = {'conv': conv_params(init, 3, 3, 256, 96), 'bn': bn_params(init, 96)}
    P['stage2'] = make_hr_module(init, 2, [48, 96], [48, 96], [4, 4])
    P['t2_2'] = {'conv': conv_params(init, 3, 3, 96, 192), 'bn': bn_params(init, 192)}
    P['stage3'] = make_hr_module(init, 3, [48, 96, 192], [48, 96, 192], [4, 4, 4])
    P['t3_3'] = {'conv': conv_params(init, 3, 3, 192, 384), 'bn': bn_params(init, 384)}
    P['stage4'] = make_hr_module(init, 4, [48, 96, 192, 384], [48, 96, 192, 384], [4, 4, 4, 4])
    C = 48 + 96 + 192 + 384
    P['last_conv1'] = conv_params(init, 1, 1, C, C, bias=True)
    P['last_bn'] = bn_params(init, C)
    P['last_conv2'] = conv_params(init, 1, 1, C, num_classes, bias=True)
    return P


def bn_fold(bn, conv_bias=None, eps=1e-5):
    scale = bn['gamma'] / jnp.sqrt(bn['var'] + eps)
    bias = bn['beta'] - bn['mean'] * scale
    if conv_bias is not None:
        bias = bias + scale * conv_bias
    return scale, bias


def _fold(cp, bnp):
    scale, bias = bn_fold(bnp, cp.get('b'))
    kh, kw, cin, cout = cp['w'].shape
    w = (cp['w'] * scale).astype(jnp.bfloat16).reshape(kh * kw * cin, cout)
    return {'w': w, 'b': bias.astype(jnp.float32)}


def _prep_basic(b):
    q = {'c1': _fold(b['conv1'], b['bn1']), 'c2': _fold(b['conv2'], b['bn2'])}
    if 'down_conv' in b:
        q['down'] = _fold(b['down_conv'], b['down_bn'])
    return q


def _prep_bottleneck(b):
    q = {'c1': _fold(b['conv1'], b['bn1']), 'c2': _fold(b['conv2'], b['bn2']),
         'c3': _fold(b['conv3'], b['bn3'])}
    if 'down_conv' in b:
        q['down'] = _fold(b['down_conv'], b['down_bn'])
    return q


def _prep_module(m):
    branches = [[_prep_basic(b) for b in br] for br in m['branches']]
    fuse = []
    for row in m['fuse']:
        qrow = []
        for cell in row:
            if cell is None:
                qrow.append(None)
            elif 'chain' in cell:
                qrow.append([_fold(s['conv'], s['bn']) for s in cell['chain']])
            else:
                qrow.append(_fold(cell['conv'], cell['bn']))
        fuse.append(qrow)
    return {'branches': branches, 'fuse': fuse}


def prepare_params(P):
    """Pre-fold BN into bf16 GEMM weights / f32 biases (done once, outside jit)."""
    Q = {'conv1': _fold(P['conv1'], P['bn1']),
         'conv2': _fold(P['conv2'], P['bn2']),
         'layer1': [_prep_bottleneck(b) for b in P['layer1']],
         't1_0': _fold(P['t1_0']['conv'], P['t1_0']['bn']),
         't1_1': _fold(P['t1_1']['conv'], P['t1_1']['bn']),
         'stage2': _prep_module(P['stage2']),
         't2_2': _fold(P['t2_2']['conv'], P['t2_2']['bn']),
         'stage3': _prep_module(P['stage3']),
         't3_3': _fold(P['t3_3']['conv'], P['t3_3']['bn']),
         'stage4': _prep_module(P['stage4'])}
    C = P['last_conv1']['w'].shape[2]
    nc = P['last_conv2']['w'].shape[3]
    s1, b1 = bn_fold(P['last_bn'], P['last_conv1']['b'])
    Q['head'] = {'w1': (P['last_conv1']['w'].reshape(C, C) * s1).astype(jnp.bfloat16),
                 'b1': b1.astype(jnp.float32),
                 'w2': P['last_conv2']['w'].reshape(C, nc).astype(jnp.bfloat16),
                 'b2': P['last_conv2']['b'].astype(jnp.float32)}
    return Q


# ----------------------------------------------------------------------------
# Forward pass
# ----------------------------------------------------------------------------

def bottleneck_fwd(x, q):
    res = conv1x1(x, q['down'], relu=False) if 'down' in q else x
    out = conv1x1(x, q['c1'], relu=True)
    out = conv3x3_s1(out, q['c2'], relu=True)
    # conv3 + BN + residual add + ReLU fused into one matmul epilogue
    return conv1x1(out, q['c3'], relu=False, residual=res)


def basic_fwd_standalone(x, b):
    # Fallback path (only if a BasicBlock has a downsample or the image is too
    # wide for the flat window); not exercised by the HRNet config.
    res = conv1x1(x, b['down'], relu=False) if 'down' in b else x
    out = conv2d_im2col(x, b['c1'], 3, 3, 1, 1, relu=True)
    return conv2d_im2col(out, b['c2'], 3, 3, 1, 1, relu=False, residual=res)


def branch_fwd(x, blocks):
    """A chain of BasicBlocks kept in the guarded flat layout end-to-end."""
    N, H, W_, _ = x.shape
    Hp, Wp = H + 2, W_ + 2
    M0 = N * Hp * Wp
    tm = _pick_flat_tm(M0)
    use_flat = (Wp + 1) <= tm and all('down' not in b for b in blocks)
    if not use_flat:
        t = x
        for b in blocks:
            t = basic_fwd_standalone(t, b)
        return t
    xflat, meta = to_flat(x, tm)
    mask = jnp.asarray(_interior_mask_np(N, Hp, Wp, tm))
    for b in blocks:
        h1 = conv3x3_flat(xflat, b['c1']['w'], b['c1']['b'], mask, True, meta, tm)
        # conv2 + BN + residual + ReLU fused; residual is the block input.
        xflat = conv3x3_flat(h1, b['c2']['w'], b['c2']['b'], mask, True, meta, tm,
                             residual=xflat)
    return from_flat(xflat, meta, tm)


def hr_module_fwd(xs, q):
    nb = len(q['branches'])
    xs = [branch_fwd(xs[i], q['branches'][i]) for i in range(nb)]
    outs = []
    for i in range(nb):
        hi, wi = xs[i].shape[1], xs[i].shape[2]
        parts = []
        for j in range(nb):
            if j == i:
                parts.append(xs[j])
            elif j > i:
                t = conv1x1(xs[j], q['fuse'][i][j], relu=False)
                parts.append(bilinear_resize_nhwc(t, hi, wi))
            else:
                t = xs[j]
                chain = q['fuse'][i][j]
                for k, step in enumerate(chain):
                    t = conv2d_im2col(t, step, 3, 3, 2, 1,
                                      relu=(k != len(chain) - 1))
                parts.append(t)
        outs.append(addn_relu(parts))      # fused sum + ReLU, one HBM pass
    return outs


def hrnet_forward(image_nchw, Q):
    # NCHW (PyTorch) -> internal NHWC bf16 -> NCHW f32 probabilities.
    x = jnp.transpose(image_nchw, (0, 2, 3, 1)).astype(jnp.bfloat16)
    x = conv2d_im2col(x, Q['conv1'], 3, 3, 2, 1, relu=True)
    x = conv2d_im2col(x, Q['conv2'], 3, 3, 2, 1, relu=True)
    for blk in Q['layer1']:
        x = bottleneck_fwd(x, blk)

    x0 = conv3x3_s1(x, Q['t1_0'], relu=True)
    x1 = conv2d_im2col(x, Q['t1_1'], 3, 3, 2, 1, relu=True)
    y = hr_module_fwd([x0, x1], Q['stage2'])

    x2 = conv2d_im2col(y[-1], Q['t2_2'], 3, 3, 2, 1, relu=True)
    y = hr_module_fwd([y[0], y[1], x2], Q['stage3'])

    x3 = conv2d_im2col(y[-1], Q['t3_3'], 3, 3, 2, 1, relu=True)
    y = hr_module_fwd([y[0], y[1], y[2], x3], Q['stage4'])

    h, w = y[0].shape[1], y[0].shape[2]
    feats = [y[0]] + [bilinear_resize_nhwc(t, h, w) for t in y[1:]]
    logit = head_fused(feats, Q['head'])               # (N, h, w, nc) f32

    # NCHW before the resize so spatial sits on the lane dim (lane-dense
    # upsample + sigmoid) and the output is already in PyTorch layout.
    logit = jnp.transpose(logit, (0, 3, 1, 2))
    # TODO(synk): upsample_scale() is undefined in the source module; assumed
    #             bilinear upsampling by scale_factor=4 (align_corners=False),
    #             with sigmoid applied AFTER the upsample as in get_probs().
    logit = bilinear_resize_nchw_f32(logit, h * 4, w * 4)
    return sigmoid_pallas(logit)                       # NCHW f32


# ----------------------------------------------------------------------------

if __name__ == "__main__":
    num_classes = 3
    key = jax.random.PRNGKey(0)
    k_img, k_par = jax.random.split(key)
    image = jax.random.normal(k_img, (2, 3, 64, 64), jnp.float32)   # NCHW
    params = make_hrnet_params(k_par, num_classes)

    prepared = jax.block_until_ready(jax.jit(prepare_params)(params))
    fwd = jax.jit(hrnet_forward)
    prob = jax.block_until_ready(fwd(image, prepared))

    assert prob.shape == (2, num_classes, 64, 64), prob.shape
    assert bool(jnp.all(jnp.isfinite(prob)))
    print("KERNEL_OK")
</pallas_src>

<mosaic_0001>
module attributes {stable_mosaic.version = 11 : i64} {
  func.func @k(%arg0: i32, %arg1: memref<8x128xf32, #tpu.memory_space<vmem>>, %arg2: memref<8x128xf32, #tpu.memory_space<vmem>>) attributes {dimension_semantics = [#tpu.dimension_semantics<arbitrary>], iteration_bounds = array<i64: 1>, scalar_prefetch = 0 : i64, scratch_operands = 0 : i64, tpu.core_type = #tpu.core_type<tc>, window_params = [{pipeline_mode = #tpu.pipeline_mode<synchronous>, transform_indices = @transform_0, window_bounds = array<i64: 8, 128>}, {pipeline_mode = #tpu.pipeline_mode<synchronous>, transform_indices = @transform_1, window_bounds = array<i64: 8, 128>}]} {
    %c0 = arith.constant 0 : index
    %c0_0 = arith.constant 0 : index
    %0 = vector.load %arg1[%c0, %c0_0] : memref<8x128xf32, #tpu.memory_space<vmem>>, vector<8x128xf32>
    %cst = arith.constant 1.000000e+00 : f32
    %1 = vector.broadcast %cst : f32 to vector<8x128xf32>
    %2 = arith.addf %0, %1 : vector<8x128xf32>
    %c0_1 = arith.constant 0 : index
    %c0_2 = arith.constant 0 : index
    %3 = vector.load %arg2[%c0_1, %c0_2] : memref<8x128xf32, #tpu.memory_space<vmem>>, vector<8x128xf32>
    tpu.vector_store %arg2[%c0_1, %c0_2], %2 {strides = array<i32>} : memref<8x128xf32, #tpu.memory_space<vmem>>, vector<8x128xf32>,
    return
  }
  func.func @transform_0(%arg0: i32) -> (i32, i32) {
    %c0_i32 = arith.constant 0 : i32
    %c0_i32_0 = arith.constant 0 : i32
    %c0_i32_1 = arith.constant 0 : i32
    return %c0_i32, %c0_i32_0 : i32, i32
  }
  func.func @transform_1(%arg0: i32) -> (i32, i32) {
    %c0_i32 = arith.constant 0 : i32
    %c0_i32_0 = arith.constant 0 : i32
    %c0_i32_1 = arith.constant 0 : i32
    return %c0_i32, %c0_i32_0 : i32, i32
  }
}

</mosaic_0001>

<bundles_post_ra>
// kernel: tpu_custom_call.1
= control target key start
LH: loop header
LB: loop body
LE: loop exit
PB: predicated region body
PF: predicated region fallthrough
CT: control target
= control target key end

     0   :  { %6 = vsyncpa [#allocation3], 0  ;;  %s103_s0 = inlined_call_operand.hbm [shape: f32[8,128], index: 0, kind: input, shape index: {}]   ;;  %s104_s1 = inlined_call_operand.hbm [shape: f32[8,128], index: 1, kind: output, shape index: {}]  }
   0x1   :  { %7 = vsyncpa [#allocation4], 0  ;;  %s85_s6 = smov [#allocation2]  }
   0x2   :  { %s14_s7 = sshll.u32 %s85_s6, 4  ;;  %s15_s7 = int_to_ptr.vmem [resolvable:$true] %s14_s7 }
   0x3   :  { %s49_s8 = scalar_lea.vmem %s15_s7, 128  ;;  %p54_p1 = scmp.lt.s32.totalorder %s15_s7, %s15_s7 }
   0x4   :  { %p50_p0 = scmp.ne.s32.totalorder %s15_s7, %s49_s8  ;;  %p55_p2 = scmp.lt.s32.totalorder %s49_s8, %s49_s8 }
   0x6   :  { %p56_p3 = por %p55_p2, %p54_p1 }
   0x8   :  { %p57_p4 = pnand %p56_p3, %p50_p0 }
   0xa   :  { %60 = shalt.err (!%p57_p4)
}
   0xb   :  { %17 = dma.hbm_to_vmem [thread:$0]  %s103_s0, 128, %s15_s7, [#allocation3]  }
   0xc   :  { %81 = dma.done.wait [#allocation3], 128  }
   0xd   :  { %82 = vsyncadd [#allocation3], 4294967168  ;;  %s86_s11 = smov [#allocation5]   ;;  %v21_v0 = vld [vmem:[#allocation2] sm:$0xff] }
   0xe   :  { %s30_s12 = sshll.u32 %s86_s11, 4  ;;  %v22_v1 = vadd.f32 1.0, %v21_v0  ;;  %s31_s12 = int_to_ptr.vmem [resolvable:$true] %s30_s12 }
   0xf   :  { %s61_s13 = scalar_lea.vmem %s31_s12, 128  ;;  %p66_p6 = scmp.lt.s32.totalorder %s31_s12, %s31_s12 }
  0x10   :  { %23 = vst [vmem:[#allocation5] sm:$0xff] %v22_v1  ;;  %p62_p5 = scmp.ne.s32.totalorder %s31_s12, %s61_s13  ;;  %p67_p7 = scmp.lt.s32.totalorder %s61_s13, %s61_s13 }
  0x12   :  { %p68_p8 = por %p67_p7, %p66_p6 }
  0x14   :  { %p69_p9 = pnand %p68_p8, %p62_p5 }
  0x16   :  { %72 = shalt.err (!%p69_p9)
}
  0x17   :  { %33 = dma.vmem_to_hbm [thread:$0]  %s31_s12, 128, %s104_s1, [#allocation4]  }
  0x18   :  { %83 = dma.done.wait [#allocation4], 128  }
  0x19   :  { %84 = vsyncadd [#allocation4], 4294967168 }
  0x1a   :  { %37 = vsyncpa [#allocation3], 1 }
  0x1b   :  { %38 = vsyncpa [#allocation4], 1 }

</bundles_post_ra>
